<compile_context>
chip_gen: v7x
topology: tpu7x:2x2x1
jax: 0.10.0
libtpu: 0.0.40
codegen_flags: <defaults>
</compile_context>

<pallas_src>
import math

import jax
import jax.numpy as jnp
from jax.experimental import pallas as pl
from jax.experimental.pallas import tpu as pltpu


def _round_up(x: int, m: int) -> int:
    return (x + m - 1) // m * m


# --------------------------------------------------------------------------
# Kernel
# --------------------------------------------------------------------------
def _urlstm_seq_kernel(x_ref, h0_ref, c0_ref, w_ref, b_ref,   # inputs
                       hy_ref, cy_ref,                         # outputs
                       h_sc, c_sc):                            # VMEM scratch
    """One time step per grid iteration; h/c carried in f32 VMEM scratch."""
    t = pl.program_id(1)

    @pl.when(t == 0)
    def _init():
        h_sc[...] = h0_ref[...].astype(jnp.float32)
        c_sc[...] = c0_ref[...].astype(jnp.float32)

    H = h_sc.shape[1]  # padded hidden size (multiple of 128)

    # Fused matmul: [x | h] @ [wi ; wh]  (single MXU push/drain).
    xh = jnp.concatenate(
        [x_ref[...].astype(jnp.float32), h_sc[...]], axis=-1
    ).astype(w_ref.dtype)
    gates = jnp.dot(xh, w_ref[...], preferred_element_type=jnp.float32) + b_ref[...]

    # Gate order matches torch.chunk(4, dim=1): [forget | refine | cell | out].
    # forget_bias is already folded into b (+fb on forget, -fb on refine).
    forget_gate = jax.nn.sigmoid(gates[:, 0 * H:1 * H])
    refine_gate = jax.nn.sigmoid(gates[:, 1 * H:2 * H])
    cell_gate = jnp.tanh(gates[:, 2 * H:3 * H])
    out_gate = jax.nn.sigmoid(gates[:, 3 * H:4 * H])

    # 2*r*f + (1-2r)*f^2  ==  f*(f + 2*r*(1-f))   (fewer VALU multiplies)
    effective_gate = forget_gate * (
        forget_gate + 2.0 * refine_gate * (1.0 - forget_gate))

    cy = effective_gate * c_sc[...] + (1.0 - effective_gate) * cell_gate
    hy = out_gate * jnp.tanh(cy)

    # Carry in f32; emit per-step outputs in the requested dtype.
    h_sc[...] = hy
    c_sc[...] = cy
    hy_ref[...] = hy.astype(hy_ref.dtype)
    cy_ref[...] = cy.astype(cy_ref.dtype)


# --------------------------------------------------------------------------
# Wrappers
# --------------------------------------------------------------------------
def _urlstm_scan(xs, h0, c0, prep):
    """Run the fused-sequence kernel.

    xs: [T, B, input_size], h0/c0: [B, H].  Returns (hys, cys) each [T, B, H].
    """
    T, B, I = xs.shape
    H, H_pad, I_pad = prep["H"], prep["H_pad"], prep["I_pad"]
    assert I == prep["I"], "input_size mismatch with prepared params"

    # Batch tiling: pad to a multiple of 8 (f32 sublanes); tile at <=128 rows.
    bt = min(128, _round_up(B, 8))
    B_pad = _round_up(B, bt)
    nb = B_pad // bt

    xs_p = jnp.pad(xs, ((0, 0), (0, B_pad - B), (0, I_pad - I)))
    h0_p = jnp.pad(h0, ((0, B_pad - B), (0, H_pad - H)))
    c0_p = jnp.pad(c0, ((0, B_pad - B), (0, H_pad - H)))

    w, b = prep["w"], prep["b"]
    KW = w.shape[0]  # I_pad + H_pad
    out_dtype = xs.dtype
    out_isize = jnp.dtype(out_dtype).itemsize

    cost = pl.CostEstimate(
        flops=2 * T * B_pad * KW * 4 * H_pad,
        transcendentals=5 * T * B_pad * H_pad,  # 3 sigmoid + 2 tanh per element
        bytes_accessed=(w.size * w.dtype.itemsize + b.size * b.dtype.itemsize
                        + xs_p.size * xs_p.dtype.itemsize
                        + 2 * B_pad * H_pad * h0_p.dtype.itemsize
                        + 2 * T * B_pad * H_pad * out_isize),
    )

    # NOTE: for large H (e.g. >= 2048 f32) cast the packed weight to bf16 in
    # prepare_params and/or tile the 4H axis with an extra grid dimension so
    # the resident weight fits v7x's 64 MiB VMEM (raise vmem_limit_bytes on
    # v6e if keeping full f32 weights resident).
    hys, cys = pl.pallas_call(
        _urlstm_seq_kernel,
        out_shape=(
            jax.ShapeDtypeStruct((T, B_pad, H_pad), out_dtype),
            jax.ShapeDtypeStruct((T, B_pad, H_pad), out_dtype),
        ),
        grid=(nb, T),
        in_specs=[
            # x_t tile: new block every time step.
            pl.BlockSpec((None, bt, I_pad), lambda bi, t: (t, bi, 0)),
            # initial state: constant over t (read only at t == 0).
            pl.BlockSpec((bt, H_pad), lambda bi, t: (bi, 0)),
            pl.BlockSpec((bt, H_pad), lambda bi, t: (bi, 0)),
            # packed weights / bias: constant index -> DMA'd once, VMEM-resident.
            pl.BlockSpec((KW, 4 * H_pad), lambda bi, t: (0, 0)),
            pl.BlockSpec((1, 4 * H_pad), lambda bi, t: (0, 0)),
        ],
        out_specs=(
            pl.BlockSpec((None, bt, H_pad), lambda bi, t: (t, bi, 0)),
            pl.BlockSpec((None, bt, H_pad), lambda bi, t: (t, bi, 0)),
        ),
        scratch_shapes=[
            pltpu.VMEM((bt, H_pad), jnp.float32),  # h carry (f32)
            pltpu.VMEM((bt, H_pad), jnp.float32),  # c carry (f32)
        ],
        compiler_params=pltpu.CompilerParams(
            dimension_semantics=("parallel", "arbitrary"),
        ),
        cost_estimate=cost,
    )(xs_p, h0_p, c0_p, w, b)

    return hys[:, :B, :H], cys[:, :B, :H]


def urlstm_cell(x, state, prep):
    """Single-step forward matching URLSTMCell.forward: returns (hy, (hy, cy))."""
    hx, cx = state
    hys, cys = _urlstm_scan(x[None], hx, cx, prep)
    hy, cy = hys[0], cys[0]
    return hy, (hy, cy)


def urlstm_sequence(xs, state, prep):
    """Fused multi-step forward: xs [T, B, I] -> (hys [T, B, H], (h_T, c_T))."""
    h0, c0 = state
    hys, cys = _urlstm_scan(xs, h0, c0, prep)
    return hys, (hys[-1], cys[-1])


# --------------------------------------------------------------------------
# Parameter construction / packing
# --------------------------------------------------------------------------
def init_params(key, input_size, hidden_size, dtype=jnp.float32):
    """Init matching URLSTMCell.reset_parameters semantics (weights transposed)."""
    stdv = 1.0 / math.sqrt(hidden_size)
    k_wi, k_bi, k_wh, k_bh, k_u = jax.random.split(key, 5)
    wi = jax.random.uniform(k_wi, (input_size, 4 * hidden_size), dtype,
                            minval=-stdv, maxval=stdv)
    bi = jax.random.uniform(k_bi, (4 * hidden_size,), dtype,
                            minval=-stdv, maxval=stdv)
    wh = jax.random.uniform(k_wh, (hidden_size, 4 * hidden_size), dtype,
                            minval=-stdv, maxval=stdv)
    bh = jax.random.uniform(k_bh, (4 * hidden_size,), dtype,
                            minval=-stdv, maxval=stdv)
    # forget_bias = -log(1/u - 1), u ~ U(1/H, 1 - 1/H)
    u = (jax.random.uniform(k_u, (hidden_size,), dtype)
         * (1.0 - 2.0 / hidden_size) + 1.0 / hidden_size)
    fb = -jnp.log(1.0 / u - 1.0)
    return {
        "wi": wi,
        "wh": wh,
        "b": (bi + bh).reshape(1, 4 * hidden_size),
        "fb": fb.reshape(1, hidden_size),
    }


def prepare_params(params, input_size, hidden_size, weight_dtype=jnp.float32):
    """Pack weights for the kernel: pad to lane-aligned sizes, stack wi over wh,
    fold forget_bias into the bias."""
    H, I = hidden_size, input_size
    H_pad = _round_up(H, 128)
    I_pad = _round_up(I, 128)

    def pad_gate_cols(w, rows, rows_pad):
        # [rows, 4H] -> [rows_pad, 4*H_pad], padding each gate chunk separately.
        w4 = w.reshape(rows, 4, H)
        w4 = jnp.pad(w4, ((0, rows_pad - rows), (0, 0), (0, H_pad - H)))
        return w4.reshape(rows_pad, 4 * H_pad)

    wi_p = pad_gate_cols(params["wi"], I, I_pad)
    wh_p = pad_gate_cols(params["wh"], H, H_pad)
    w_packed = jnp.concatenate([wi_p, wh_p], axis=0).astype(weight_dtype)

    b4 = params["b"].reshape(4, H)
    fb = params["fb"].reshape(H)
    b4 = b4.at[0].add(fb).at[1].add(-fb)       # fold forget_bias (exact)
    b4 = jnp.pad(b4, ((0, 0), (0, H_pad - H)))
    b_packed = b4.reshape(1, 4 * H_pad).astype(jnp.float32)

    return {"w": w_packed, "b": b_packed,
            "H": H, "H_pad": H_pad, "I": I, "I_pad": I_pad}


# --------------------------------------------------------------------------
# Pure-JAX reference (unpacked params) for correctness checks
# --------------------------------------------------------------------------
def urlstm_cell_ref(x, state, params):
    hx, cx = state
    gates = x @ params["wi"] + hx @ params["wh"] + params["b"]
    f, r, c, o = jnp.split(gates, 4, axis=1)
    fb = params["fb"]
    forget = jax.nn.sigmoid(f + fb)
    refine = jax.nn.sigmoid(r - fb)
    cell = jnp.tanh(c)
    out = jax.nn.sigmoid(o)
    eff = 2 * refine * forget + (1 - 2 * refine) * forget ** 2
    cy = eff * cx + (1 - eff) * cell
    hy = out * jnp.tanh(cy)
    return hy, (hy, cy)


if __name__ == "__main__":
    input_size = 16
    hidden_size = 32
    batch = 2
    seq = 8

    key = jax.random.PRNGKey(0)
    k_p, k_x, k_h, k_c, k_xs = jax.random.split(key, 5)

    params = init_params(k_p, input_size, hidden_size)
    prep = prepare_params(params, input_size, hidden_size)

    x = jax.random.normal(k_x, (batch, input_size), jnp.float32)
    hx = jax.random.normal(k_h, (batch, hidden_size), jnp.float32)
    cx = jax.random.normal(k_c, (batch, hidden_size), jnp.float32)

    # ---- single step (matches URLSTMCell.forward) ----
    hy, (hy2, cy) = urlstm_cell(x, (hx, cx), prep)
    jax.block_until_ready((hy, cy))

    hy_ref, (_, cy_ref) = urlstm_cell_ref(x, (hx, cx), params)
    assert jnp.allclose(hy, hy_ref, atol=1e-5, rtol=1e-4), "hy mismatch"
    assert jnp.allclose(cy, cy_ref, atol=1e-5, rtol=1e-4), "cy mismatch"

    # ---- fused sequence: weights DMA'd once, resident across all T steps ----
    xs = jax.random.normal(k_xs, (seq, batch, input_size), jnp.float32)
    hys, (hT, cT) = urlstm_sequence(xs, (hx, cx), prep)
    jax.block_until_ready((hys, hT, cT))

    h_r, c_r = hx, cx
    hys_ref = []
    for t in range(seq):
        h_r, (_, c_r) = urlstm_cell_ref(xs[t], (h_r, c_r), params)
        hys_ref.append(h_r)
    hys_ref = jnp.stack(hys_ref)
    assert jnp.allclose(hys, hys_ref, atol=1e-4, rtol=1e-3), "sequence hy mismatch"
    assert jnp.allclose(hT, h_r, atol=1e-4, rtol=1e-3), "final h mismatch"
    assert jnp.allclose(cT, c_r, atol=1e-4, rtol=1e-3), "final c mismatch"

    print("KERNEL_OK")
</pallas_src>

<mosaic_0001>
module attributes {stable_mosaic.version = 11 : i64} {
  func.func @_urlstm_seq_kernel(%arg0: i32, %arg1: i32, %arg2: memref<1x8x128xf32, #tpu.memory_space<vmem>>, %arg3: memref<8x128xf32, #tpu.memory_space<vmem>>, %arg4: memref<8x128xf32, #tpu.memory_space<vmem>>, %arg5: memref<256x512xf32, #tpu.memory_space<vmem>>, %arg6: memref<1x512xf32, #tpu.memory_space<vmem>>, %arg7: memref<1x8x128xf32, #tpu.memory_space<vmem>>, %arg8: memref<1x8x128xf32, #tpu.memory_space<vmem>>, %arg9: memref<8x128xf32, #tpu.memory_space<vmem>>, %arg10: memref<8x128xf32, #tpu.memory_space<vmem>>) attributes {dimension_semantics = [#tpu.dimension_semantics<parallel>, #tpu.dimension_semantics<arbitrary>], iteration_bounds = array<i64: 1, 1>, scalar_prefetch = 0 : i64, scratch_operands = 2 : i64, tpu.core_type = #tpu.core_type<tc>, window_params = [{transform_indices = @transform_0, window_bounds = array<i64: 1, 8, 128>}, {transform_indices = @transform_1, window_bounds = array<i64: 8, 128>}, {transform_indices = @transform_2, window_bounds = array<i64: 8, 128>}, {pipeline_mode = #tpu.pipeline_mode<synchronous>, transform_indices = @transform_3, window_bounds = array<i64: 256, 512>}, {pipeline_mode = #tpu.pipeline_mode<synchronous>, transform_indices = @transform_4, window_bounds = array<i64: 1, 512>}, {transform_indices = @transform_5, window_bounds = array<i64: 1, 8, 128>}, {transform_indices = @transform_6, window_bounds = array<i64: 1, 8, 128>}]} {
    %c0_i32 = arith.constant 0 : i32
    %0 = arith.cmpi eq, %arg1, %c0_i32 : i32
    %1 = arith.extui %0 : i1 to i32
    %c0_i32_0 = arith.constant 0 : i32
    %2 = arith.cmpi ne, %1, %c0_i32_0 : i32
    scf.if %2 {
      %c0_27 = arith.constant 0 : index
      %c0_28 = arith.constant 0 : index
      %55 = vector.load %arg3[%c0_27, %c0_28] : memref<8x128xf32, #tpu.memory_space<vmem>>, vector<8x128xf32>
      %c0_29 = arith.constant 0 : index
      %c0_30 = arith.constant 0 : index
      %56 = vector.load %arg9[%c0_29, %c0_30] : memref<8x128xf32, #tpu.memory_space<vmem>>, vector<8x128xf32>
      tpu.vector_store %arg9[%c0_29, %c0_30], %55 {strides = array<i32>} : memref<8x128xf32, #tpu.memory_space<vmem>>, vector<8x128xf32>,
      %c0_31 = arith.constant 0 : index
      %c0_32 = arith.constant 0 : index
      %57 = vector.load %arg4[%c0_31, %c0_32] : memref<8x128xf32, #tpu.memory_space<vmem>>, vector<8x128xf32>
      %c0_33 = arith.constant 0 : index
      %c0_34 = arith.constant 0 : index
      %58 = vector.load %arg10[%c0_33, %c0_34] : memref<8x128xf32, #tpu.memory_space<vmem>>, vector<8x128xf32>
      tpu.vector_store %arg10[%c0_33, %c0_34], %57 {strides = array<i32>} : memref<8x128xf32, #tpu.memory_space<vmem>>, vector<8x128xf32>,
    } else {
    }
    %c0 = arith.constant 0 : index
    %c0_1 = arith.constant 0 : index
    %c0_2 = arith.constant 0 : index
    %3 = vector.load %arg2[%c0, %c0_1, %c0_2] : memref<1x8x128xf32, #tpu.memory_space<vmem>>, vector<1x8x128xf32>
    %4 = vector.shape_cast %3 : vector<1x8x128xf32> to vector<8x128xf32>
    %c0_3 = arith.constant 0 : index
    %c0_4 = arith.constant 0 : index
    %5 = vector.load %arg9[%c0_3, %c0_4] : memref<8x128xf32, #tpu.memory_space<vmem>>, vector<8x128xf32>
    %6 = tpu.concatenate %4, %5 in 1 : vector<8x128xf32>, vector<8x128xf32> -> vector<8x256xf32>
    %c0_5 = arith.constant 0 : index
    %c0_6 = arith.constant 0 : index
    %7 = vector.load %arg5[%c0_5, %c0_6] : memref<256x512xf32, #tpu.memory_space<vmem>>, vector<256x512xf32>
    %cst = arith.constant dense<0.000000e+00> : vector<8x512xf32>
    %8 = tpu.matmul %6, %7, %cst {dimension_numbers = #tpu.dot_dimension_numbers<[1], [0], [0], [1], [0, 0, 1, 1], [], []>} : vector<8x256xf32>, vector<256x512xf32>, vector<8x512xf32> -> vector<8x512xf32>
    %c0_7 = arith.constant 0 : index
    %c0_8 = arith.constant 0 : index
    %9 = vector.load %arg6[%c0_7, %c0_8] : memref<1x512xf32, #tpu.memory_space<vmem>>, vector<1x512xf32>
    %10 = vector.broadcast %9 : vector<1x512xf32> to vector<8x512xf32>
    %11 = arith.addf %8, %10 : vector<8x512xf32>
    %12 = vector.extract_strided_slice %11 {offsets = [0, 0], sizes = [8, 128], strides = [1, 1]} : vector<8x512xf32> to vector<8x128xf32>
    %13 = arith.negf %12 : vector<8x128xf32>
    %14 = math.exp %13 : vector<8x128xf32>
    %cst_9 = arith.constant 1.000000e+00 : f32
    %15 = vector.broadcast %cst_9 : f32 to vector<8x128xf32>
    %16 = arith.addf %15, %14 : vector<8x128xf32>
    %17 = arith.divf %15, %16 : vector<8x128xf32>
    %18 = vector.extract_strided_slice %11 {offsets = [0, 128], sizes = [8, 128], strides = [1, 1]} : vector<8x512xf32> to vector<8x128xf32>
    %19 = arith.negf %18 : vector<8x128xf32>
    %20 = math.exp %19 : vector<8x128xf32>
    %cst_10 = arith.constant 1.000000e+00 : f32
    %21 = vector.broadcast %cst_10 : f32 to vector<8x128xf32>
    %22 = arith.addf %21, %20 : vector<8x128xf32>
    %23 = arith.divf %21, %22 : vector<8x128xf32>
    %24 = vector.extract_strided_slice %11 {offsets = [0, 256], sizes = [8, 128], strides = [1, 1]} : vector<8x512xf32> to vector<8x128xf32>
    %25 = math.tanh %24 : vector<8x128xf32>
    %26 = vector.extract_strided_slice %11 {offsets = [0, 384], sizes = [8, 128], strides = [1, 1]} : vector<8x512xf32> to vector<8x128xf32>
    %27 = arith.negf %26 : vector<8x128xf32>
    %28 = math.exp %27 : vector<8x128xf32>
    %cst_11 = arith.constant 1.000000e+00 : f32
    %29 = vector.broadcast %cst_11 : f32 to vector<8x128xf32>
    %30 = arith.addf %29, %28 : vector<8x128xf32>
    %31 = arith.divf %29, %30 : vector<8x128xf32>
    %cst_12 = arith.constant 2.000000e+00 : f32
    %32 = vector.broadcast %cst_12 : f32 to vector<8x128xf32>
    %33 = arith.mulf %32, %23 : vector<8x128xf32>
    %cst_13 = arith.constant 1.000000e+00 : f32
    %34 = vector.broadcast %cst_13 : f32 to vector<8x128xf32>
    %35 = arith.subf %34, %17 : vector<8x128xf32>
    %36 = arith.mulf %33, %35 : vector<8x128xf32>
    %37 = arith.addf %17, %36 : vector<8x128xf32>
    %38 = arith.mulf %17, %37 : vector<8x128xf32>
    %c0_14 = arith.constant 0 : index
    %c0_15 = arith.constant 0 : index
    %39 = vector.load %arg10[%c0_14, %c0_15] : memref<8x128xf32, #tpu.memory_space<vmem>>, vector<8x128xf32>
    %40 = arith.mulf %38, %39 : vector<8x128xf32>
    %cst_16 = arith.constant 1.000000e+00 : f32
    %41 = vector.broadcast %cst_16 : f32 to vector<8x128xf32>
    %42 = arith.subf %41, %38 : vector<8x128xf32>
    %43 = arith.mulf %42, %25 : vector<8x128xf32>
    %44 = arith.addf %40, %43 : vector<8x128xf32>
    %45 = math.tanh %44 : vector<8x128xf32>
    %46 = arith.mulf %31, %45 : vector<8x128xf32>
    %c0_17 = arith.constant 0 : index
    %c0_18 = arith.constant 0 : index
    %47 = vector.load %arg9[%c0_17, %c0_18] : memref<8x128xf32, #tpu.memory_space<vmem>>, vector<8x128xf32>
    tpu.vector_store %arg9[%c0_17, %c0_18], %46 {strides = array<i32>} : memref<8x128xf32, #tpu.memory_space<vmem>>, vector<8x128xf32>,
    %c0_19 = arith.constant 0 : index
    %c0_20 = arith.constant 0 : index
    %48 = vector.load %arg10[%c0_19, %c0_20] : memref<8x128xf32, #tpu.memory_space<vmem>>, vector<8x128xf32>
    tpu.vector_store %arg10[%c0_19, %c0_20], %44 {strides = array<i32>} : memref<8x128xf32, #tpu.memory_space<vmem>>, vector<8x128xf32>,
    %c0_21 = arith.constant 0 : index
    %c0_22 = arith.constant 0 : index
    %c0_23 = arith.constant 0 : index
    %49 = vector.load %arg7[%c0_21, %c0_22, %c0_23] : memref<1x8x128xf32, #tpu.memory_space<vmem>>, vector<1x8x128xf32>
    %50 = vector.shape_cast %49 : vector<1x8x128xf32> to vector<8x128xf32>
    %51 = vector.shape_cast %46 : vector<8x128xf32> to vector<1x8x128xf32>
    tpu.vector_store %arg7[%c0_21, %c0_22, %c0_23], %51 {strides = array<i32>} : memref<1x8x128xf32, #tpu.memory_space<vmem>>, vector<1x8x128xf32>,
    %c0_24 = arith.constant 0 : index
    %c0_25 = arith.constant 0 : index
    %c0_26 = arith.constant 0 : index
    %52 = vector.load %arg8[%c0_24, %c0_25, %c0_26] : memref<1x8x128xf32, #tpu.memory_space<vmem>>, vector<1x8x128xf32>
    %53 = vector.shape_cast %52 : vector<1x8x128xf32> to vector<8x128xf32>
    %54 = vector.shape_cast %44 : vector<8x128xf32> to vector<1x8x128xf32>
    tpu.vector_store %arg8[%c0_24, %c0_25, %c0_26], %54 {strides = array<i32>} : memref<1x8x128xf32, #tpu.memory_space<vmem>>, vector<1x8x128xf32>,
    return
  }
  func.func @transform_0(%arg0: i32, %arg1: i32) -> (i32, i32, i32) {
    %c0_i32 = arith.constant 0 : i32
    %c0_i32_0 = arith.constant 0 : i32
    return %arg1, %arg0, %c0_i32 : i32, i32, i32
  }
  func.func @transform_1(%arg0: i32, %arg1: i32) -> (i32, i32) {
    %c0_i32 = arith.constant 0 : i32
    %c0_i32_0 = arith.constant 0 : i32
    return %arg0, %c0_i32 : i32, i32
  }
  func.func @transform_2(%arg0: i32, %arg1: i32) -> (i32, i32) {
    %c0_i32 = arith.constant 0 : i32
    %c0_i32_0 = arith.constant 0 : i32
    return %arg0, %c0_i32 : i32, i32
  }
  func.func @transform_3(%arg0: i32, %arg1: i32) -> (i32, i32) {
    %c0_i32 = arith.constant 0 : i32
    %c0_i32_0 = arith.constant 0 : i32
    %c0_i32_1 = arith.constant 0 : i32
    return %c0_i32, %c0_i32_0 : i32, i32
  }
  func.func @transform_4(%arg0: i32, %arg1: i32) -> (i32, i32) {
    %c0_i32 = arith.constant 0 : i32
    %c0_i32_0 = arith.constant 0 : i32
    %c0_i32_1 = arith.constant 0 : i32
    return %c0_i32, %c0_i32_0 : i32, i32
  }
  func.func @transform_5(%arg0: i32, %arg1: i32) -> (i32, i32, i32) {
    %c0_i32 = arith.constant 0 : i32
    %c0_i32_0 = arith.constant 0 : i32
    return %arg1, %arg0, %c0_i32 : i32, i32, i32
  }
  func.func @transform_6(%arg0: i32, %arg1: i32) -> (i32, i32, i32) {
    %c0_i32 = arith.constant 0 : i32
    %c0_i32_0 = arith.constant 0 : i32
    return %arg1, %arg0, %c0_i32 : i32, i32, i32
  }
}

</mosaic_0001>

<bundles_post_ra>
// kernel: tpu_custom_call.1
= control target key start
LH: loop header
LB: loop body
LE: loop exit
PB: predicated region body
PF: predicated region fallthrough
CT: control target
= control target key end

     0   :  { %12 = vsyncpa [#allocation5], 0  ;;  %s863_s0 = inlined_call_operand.hbm [shape: f32[1,8,128], index: 0, kind: input, shape index: {}]   ;;  %s864_s1 = inlined_call_operand.hbm [shape: f32[8,128], index: 1, kind: input, shape index: {}]   ;;  %s865_s2 = inlined_call_operand.hbm [shape: f32[8,128], index: 2, kind: input, shape index: {}]   ;;  %s866_s3 = inlined_call_operand.hbm [shape: f32[256,512], index: 3, kind: input, shape index: {}]   ;;  %s867_s4 = inlined_call_operand.vmem [shape: f32[1,512], index: 4, kind: input, shape index: {}]   ;;  %s868_s5 = inlined_call_operand.hbm [shape: f32[1,8,128], index: 5, kind: output, shape index: {0}]   ;;  %s869_s6 = inlined_call_operand.hbm [shape: f32[1,8,128], index: 6, kind: output, shape index: {1}]  }
   0x1   :  { %13 = vsyncpa [#allocation8], 0 }
   0x2   :  { %14 = vsyncpa [#allocation11], 0 }
   0x3   :  { %15 = vsyncpa [#allocation6], 0 }
   0x4   :  { %16 = vsyncpa [#allocation14], 0  ;;  %s738_s21 = smov [#allocation7]   ;;  %s739_s23 = smov [#allocation4]  }
   0x5   :  { %s33_s22 = sshll.u32 %s738_s21, 4  ;;  %s23_s24 = sshll.u32 %s739_s23, 4  ;;  %s34_s22 = int_to_ptr.vmem [resolvable:$true] %s33_s22  ;;  %s24_s24 = int_to_ptr.vmem [resolvable:$true] %s23_s24 }
   0x6   :  { %s596_s27 = scalar_lea.hbm %s864_s1, 128 }
   0x7   :  { %p597_p0 = scmp.ne.s32.totalorder %s864_s1, %s596_s27  ;;  %p600_p1 = scmp.lt.u32.totalorder %s596_s27, %s864_s1 }
   0x9   :  { %p602_p2 = pnand %p600_p1, %p597_p0 }
   0xb   :  { %605 = shalt.err (!%p602_p2)
}
   0xc   :  { %s606_s8 = scalar_lea.vmem %s34_s22, 128  ;;  %p611_p4 = scmp.lt.s32.totalorder %s34_s22, %s34_s22 }
   0xd   :  { %p607_p3 = scmp.ne.s32.totalorder %s34_s22, %s606_s8  ;;  %p612_p5 = scmp.lt.s32.totalorder %s606_s8, %s606_s8 }
   0xf   :  { %p613_p6 = por %p612_p5, %p611_p4 }
  0x11   :  { %p614_p7 = pnand %p613_p6, %p607_p3 }
  0x13   :  { %617 = shalt.err (!%p614_p7)
}
  0x14   :  { %36 = dma.hbm_to_vmem [thread:$0]  %s864_s1, 128, %s34_s22, [#allocation8]  }
  0x15   :  { %s618_s13 = scalar_lea.hbm %s863_s0, 128 }
  0x16   :  { %p619_p8 = scmp.ne.s32.totalorder %s863_s0, %s618_s13  ;;  %p622_p9 = scmp.lt.u32.totalorder %s618_s13, %s863_s0 }
  0x18   :  { %p624_p10 = pnand %p622_p9, %p619_p8 }
  0x1a   :  { %627 = shalt.err (!%p624_p10)
}
  0x1b   :  { %s628_s18 = scalar_lea.vmem %s24_s24, 128  ;;  %p633_p12 = scmp.lt.s32.totalorder %s24_s24, %s24_s24 }
  0x1c   :  { %p629_p11 = scmp.ne.s32.totalorder %s24_s24, %s628_s18  ;;  %p634_p13 = scmp.lt.s32.totalorder %s628_s18, %s628_s18 }
  0x1e   :  { %p635_p0 = por %p634_p13, %p633_p12 }
  0x20   :  { %p636_p1 = pnand %p635_p0, %p629_p11 }
  0x22   :  { %639 = shalt.err (!%p636_p1)
}
  0x23   :  { %26 = dma.hbm_to_vmem [thread:$0]  %s863_s0, 128, %s24_s24, [#allocation5]  }
  0x24   :  { %s740_s20 = smov [#allocation9]   ;;  %s741_s22 = smov [#allocation10]  }
  0x25   :  { %s43_s21 = sshll.u32 %s740_s20, 4  ;;  %s52_s23 = sshll.u32 %s741_s22, 4  ;;  %s44_s21 = int_to_ptr.vmem [resolvable:$true] %s43_s21  ;;  %s805_s23 = int_to_ptr.vmem [resolvable:$true] %s52_s23 }
  0x26   :  { %s640_s27 = scalar_lea.hbm %s865_s2, 128 }
  0x27   :  { %p641_p2 = scmp.ne.s32.totalorder %s865_s2, %s640_s27  ;;  %p644_p3 = scmp.lt.u32.totalorder %s640_s27, %s865_s2 }
  0x29   :  { %p646_p4 = pnand %p644_p3, %p641_p2 }
  0x2b   :  { %649 = shalt.err (!%p646_p4)
}
  0x2c   :  { %s650_s0 = scalar_lea.vmem %s44_s21, 128  ;;  %p655_p6 = scmp.lt.s32.totalorder %s44_s21, %s44_s21 }
  0x2d   :  { %p651_p5 = scmp.ne.s32.totalorder %s44_s21, %s650_s0  ;;  %p656_p7 = scmp.lt.s32.totalorder %s650_s0, %s650_s0 }
  0x2f   :  { %p657_p8 = por %p656_p7, %p655_p6 }
  0x31   :  { %p658_p9 = pnand %p657_p8, %p651_p5 }
  0x33   :  { %661 = shalt.err (!%p658_p9)
}
  0x34   :  { %46 = dma.hbm_to_vmem [thread:$0]  %s865_s2, 128, %s44_s21, [#allocation8]  }
  0x35   :  { %s662_s11 = scalar_lea.hbm %s866_s3, 16384 }
  0x36   :  { %p663_p10 = scmp.ne.s32.totalorder %s866_s3, %s662_s11  ;;  %p666_p11 = scmp.lt.u32.totalorder %s662_s11, %s866_s3 }
  0x38   :  { %p668_p12 = pnand %p666_p11, %p663_p10 }
  0x3a   :  { %671 = shalt.err (!%p668_p12)
}
  0x3b   :  { %s672_s16 = scalar_lea.vmem %s805_s23, 16384  ;;  %p677_p0 = scmp.lt.s32.totalorder %s805_s23, %s805_s23 }
  0x3c   :  { %p673_p13 = scmp.ne.s32.totalorder %s805_s23, %s672_s16  ;;  %p678_p1 = scmp.lt.s32.totalorder %s672_s16, %s672_s16 }
  0x3e   :  { %p679_p2 = por %p678_p1, %p677_p0 }
  0x40   :  { %p680_p3 = pnand %p679_p2, %p673_p13 }
  0x42   :  { %683 = shalt.err (!%p680_p3)
}
  0x43   :  { %s742_s2 = smov 512   ;;  %s743_s17 = smov 32  }
  0x44   :  { %58 = dma.hbm_to_vmem [thread:$0]  %s866_s3, 16384, %s805_s23, [#allocation11], %s742_s2, %s742_s2, %s743_s17  }
  0x45   :  { %728 = dma.done.wait [#allocation5], 128  }
  0x46   :  { %729 = vsyncadd [#allocation5], 4294967168 }
  0x47   :  { %730 = dma.done.wait [#allocation8], 256  }
  0x48   :  { %731 = vsyncadd [#allocation8], 4294967040 }
  0x49   :  { %732 = dma.done.wait [#allocation11], 16384  }
  0x4a   :  { %733 = vsyncadd [#allocation11], 4294950912  ;;  %v84_v0 = vld [vmem:[#allocation10 + $0x8] sm:$0xff]  ;;  %v83_v2 = vld [vmem:[#allocation10] sm:$0xff] }
  0x4b   :  { %v88_v1 = vld [vmem:[#allocation10 + $0x28] sm:$0xff]  ;;  %v87_v4 = vld [vmem:[#allocation10 + $0x20] sm:$0xff]  ;;  %v86_v21 = vld [vmem:[#allocation10 + $0x18] sm:$0xff] }
  0x4c   :  { %v444_v3 = vpack.c.bf16 %v88_v1, %v84_v0  ;;  %v92_v5 = vld [vmem:[#allocation10 + $0x48] sm:$0xff]  ;;  %v446_v7 = vpack.c.bf16 %v87_v4, %v83_v2  ;;  %v91_v9 = vld [vmem:[#allocation10 + $0x40] sm:$0xff]  ;;  %v90_v25 = vld [vmem:[#allocation10 + $0x38] sm:$0xff] }
  0x4d   :  { %v96_v6 = vld [vmem:[#allocation10 + $0x68] sm:$0xff]  ;;  %v95_v10 = vld [vmem:[#allocation10 + $0x60] sm:$0xff]  ;;  %v508_v27 = vpack.c.bf16 %v90_v25, %v86_v21  ;;  %v85_v28 = vld [vmem:[#allocation10 + $0x10] sm:$0xff] }
  0x4e   :  { %v448_v8 = vpack.c.bf16 %v96_v6, %v92_v5  ;;  %v100_v11 = vld [vmem:[#allocation10 + $0x88] sm:$0xff]  ;;  %445 = vmatprep.subr.bf16.mxu0 %v444_v3  ;;  %v450_v13 = vpack.c.bf16 %v95_v10, %v91_v9  ;;  %v99_v15 = vld [vmem:[#allocation10 + $0x80] sm:$0xff]  ;;  %v89_v29 = vld [vmem:[#allocation10 + $0x30] sm:$0xff] }
  0x4f   :  { %v104_v12 = vld [vmem:[#allocation10 + $0xa8] sm:$0xff]  ;;  %447 = vmatpush1.bf16.msra.mxu0 %v446_v7  ;;  %v103_v16 = vld [vmem:[#allocation10 + $0xa0] sm:$0xff]  ;;  %v510_v30 = vpack.c.bf16 %v89_v29, %v85_v28  ;;  %v94_v31 = vld [vmem:[#allocation10 + $0x58] sm:$0xff]  ;;  %509 = vmatprep.subr.bf16.mxu1 %v508_v27 }
  0x50   :  { %449 = vmatprep.subr.bf16.mxu0 %v448_v8  ;;  %v452_v14 = vpack.c.bf16 %v104_v12, %v100_v11  ;;  %v108_v17 = vld [vmem:[#allocation10 + $0xc8] sm:$0xff]  ;;  %v454_v19 = vpack.c.bf16 %v103_v16, %v99_v15  ;;  %v107_v20 = vld [vmem:[#allocation10 + $0xc0] sm:$0xff]  ;;  %v98_v32 = vld [vmem:[#allocation10 + $0x78] sm:$0xff] }
  0x51   :  { %v112_v18 = vld [vmem:[#allocation10 + $0xe8] sm:$0xff]  ;;  %v111_v23 = vld [vmem:[#allocation10 + $0xe0] sm:$0xff]  ;;  %v512_v35 = vpack.c.bf16 %v98_v32, %v94_v31  ;;  %v93_v36 = vld [vmem:[#allocation10 + $0x50] sm:$0xff]  ;;  %511 = vmatpush1.bf16.msra.mxu1 %v510_v30 }
  0x52   :  { %v456_v22 = vpack.c.bf16 %v112_v18, %v108_v17  ;;  %v116_v24 = vld [vmem:[#allocation10 + $0x108] sm:$0xff]  ;;  %v458_v33 = vpack.c.bf16 %v111_v23, %v107_v20  ;;  %v115_v34 = vld [vmem:[#allocation10 + $0x100] sm:$0xff]  ;;  %v97_v40 = vld [vmem:[#allocation10 + $0x70] sm:$0xff] }
  0x53   :  { %451 = vmatpush1.bf16.msra.mxu0 %v450_v13  ;;  %v120_v26 = vld [vmem:[#allocation10 + $0x128] sm:$0xff]  ;;  %v119_v38 = vld [vmem:[#allocation10 + $0x120] sm:$0xff]  ;;  %513 = vmatprep.subr.bf16.mxu1 %v512_v35  ;;  %v514_v42 = vpack.c.bf16 %v97_v40, %v93_v36  ;;  %v102_v43 = vld [vmem:[#allocation10 + $0x98] sm:$0xff] }
  0x54   :  { %453 = vmatprep.subr.bf16.mxu0 %v452_v14  ;;  %v460_v37 = vpack.c.bf16 %v120_v26, %v116_v24  ;;  %v124_v39 = vld [vmem:[#allocation10 + $0x148] sm:$0xff]  ;;  %v106_v44 = vld [vmem:[#allocation10 + $0xb8] sm:$0xff]  ;;  %v101_v46 = vld [vmem:[#allocation10 + $0x90] sm:$0xff]  ;;  %v462_v48 = vpack.c.bf16 %v119_v38, %v115_v34 }
  0x55   :  { %v128_v41 = vld [vmem:[#allocation10 + $0x168] sm:$0xff]  ;;  %v516_v45 = vpack.c.bf16 %v106_v44, %v102_v43  ;;  %v105_v47 = vld [vmem:[#allocation10 + $0xb0] sm:$0xff]  ;;  %v123_v49 = vld [vmem:[#allocation10 + $0x140] sm:$0xff]  ;;  %515 = vmatpush1.bf16.msra.mxu1 %v514_v42 }
  0x56   :  { %v110_v50 = vld [vmem:[#allocation10 + $0xd8] sm:$0xff]  ;;  %v464_v51 = vpack.c.bf16 %v128_v41, %v124_v39  ;;  %v127_v52 = vld [vmem:[#allocation10 + $0x160] sm:$0xff]  ;;  %v132_v53 = vld [vmem:[#allocation10 + $0x188] sm:$0xff]  ;;  %v518_v54 = vpack.c.bf16 %v105_v47, %v101_v46 }
  0x57   :  { %455 = vmatpush1.bf16.msra.mxu0 %v454_v19  ;;  %v114_v55 = vld [vmem:[#allocation10 + $0xf8] sm:$0xff]  ;;  %v136_v56 = vld [vmem:[#allocation10 + $0x1a8] sm:$0xff]  ;;  %517 = vmatprep.subr.bf16.mxu1 %v516_v45  ;;  %v109_v58 = vld [vmem:[#allocation10 + $0xd0] sm:$0xff]  ;;  %v466_v62 = vpack.c.bf16 %v127_v52, %v123_v49 }
  0x58   :  { %457 = vmatprep.subr.bf16.mxu0 %v456_v22  ;;  %v520_v57 = vpack.c.bf16 %v114_v55, %v110_v50  ;;  %v113_v59 = vld [vmem:[#allocation10 + $0xf0] sm:$0xff]  ;;  %v118_v60 = vld [vmem:[#allocation10 + $0x118] sm:$0xff]  ;;  %v468_v63 = vpack.c.bf16 %v136_v56, %v132_v53  ;;  %v131_v0 = vld [vmem:[#allocation10 + $0x180] sm:$0xff] }
  0x59   :  { %v122_v61 = vld [vmem:[#allocation10 + $0x138] sm:$0xff]  ;;  %v135_v1 = vld [vmem:[#allocation10 + $0x1a0] sm:$0xff]  ;;  %v140_v2 = vld [vmem:[#allocation10 + $0x1c8] sm:$0xff]  ;;  %519 = vmatpush1.bf16.msra.mxu1 %v518_v54  ;;  %v522_v3 = vpack.c.bf16 %v113_v59, %v109_v58 }
  0x5a   :  { %v144_v4 = vld [vmem:[#allocation10 + $0x1e8] sm:$0xff]  ;;  %521 = vmatprep.subr.bf16.mxu1 %v520_v57  ;;  %v524_v5 = vpack.c.bf16 %v122_v61, %v118_v60  ;;  %v117_v6 = vld [vmem:[#allocation10 + $0x110] sm:$0xff]  ;;  %v126_v8 = vld [vmem:[#allocation10 + $0x158] sm:$0xff]  ;;  %v470_v10 = vpack.c.bf16 %v135_v1, %v131_v0 }
  0x5b   :  { %459 = vmatpush1.bf16.msra.mxu0 %v458_v33  ;;  %v121_v7 = vld [vmem:[#allocation10 + $0x130] sm:$0xff]  ;;  %v130_v9 = vld [vmem:[#allocation10 + $0x178] sm:$0xff]  ;;  %v472_v11 = vpack.c.bf16 %v144_v4, %v140_v2  ;;  %v139_v12 = vld [vmem:[#allocation10 + $0x1c0] sm:$0xff] }
  0x5c   :  { %461 = vmatprep.subr.bf16.mxu0 %v460_v37  ;;  %v143_v13 = vld [vmem:[#allocation10 + $0x1e0] sm:$0xff]  ;;  %v148_v14 = vld [vmem:[#allocation10 + $0x208] sm:$0xff]  ;;  %v526_v15 = vpack.c.bf16 %v121_v7, %v117_v6  ;;  %v528_v17 = vpack.c.bf16 %v130_v9, %v126_v8  ;;  %v125_v18 = vld [vmem:[#allocation10 + $0x150] sm:$0xff] }
  0x5d   :  { %523 = vmatpush1.bf16.msra.mxu1 %v522_v3  ;;  %v152_v16 = vld [vmem:[#allocation10 + $0x228] sm:$0xff]  ;;  %v129_v19 = vld [vmem:[#allocation10 + $0x170] sm:$0xff]  ;;  %v134_v20 = vld [vmem:[#allocation10 + $0x198] sm:$0xff]  ;;  %v474_v22 = vpack.c.bf16 %v143_v13, %v139_v12 }
  0x5e   :  { %525 = vmatprep.subr.bf16.mxu1 %v524_v5  ;;  %v138_v21 = vld [vmem:[#allocation10 + $0x1b8] sm:$0xff]  ;;  %v476_v23 = vpack.c.bf16 %v152_v16, %v148_v14  ;;  %v147_v24 = vld [vmem:[#allocation10 + $0x200] sm:$0xff]  ;;  %v156_v26 = vld [vmem:[#allocation10 + $0x248] sm:$0xff]  ;;  %v530_v27 = vpack.c.bf16 %v129_v19, %v125_v18 }
  0x5f   :  { %463 = vmatpush1.bf16.msra.mxu0 %v462_v48  ;;  %v151_v25 = vld [vmem:[#allocation10 + $0x220] sm:$0xff]  ;;  %v160_v28 = vld [vmem:[#allocation10 + $0x268] sm:$0xff]  ;;  %v532_v29 = vpack.c.bf16 %v138_v21, %v134_v20  ;;  %v133_v30 = vld [vmem:[#allocation10 + $0x190] sm:$0xff] }
  0x60   :  { %465 = vmatprep.subr.bf16.mxu0 %v464_v51  ;;  %v137_v31 = vld [vmem:[#allocation10 + $0x1b0] sm:$0xff]  ;;  %v142_v32 = vld [vmem:[#allocation10 + $0x1d8] sm:$0xff]  ;;  %v478_v34 = vpack.c.bf16 %v151_v25, %v147_v24  ;;  %v155_v35 = vld [vmem:[#allocation10 + $0x240] sm:$0xff]  ;;  %v480_v36 = vpack.c.bf16 %v160_v28, %v156_v26 }
  0x61   :  { %527 = vmatpush1.bf16.msra.mxu1 %v526_v15  ;;  %v146_v33 = vld [vmem:[#allocation10 + $0x1f8] sm:$0xff]  ;;  %v159_v37 = vld [vmem:[#allocation10 + $0x260] sm:$0xff]  ;;  %v164_v38 = vld [vmem:[#allocation10 + $0x288] sm:$0xff]  ;;  %v534_v40 = vpack.c.bf16 %v137_v31, %v133_v30 }
  0x62   :  { %529 = vmatprep.subr.bf16.mxu1 %v528_v17  ;;  %v168_v39 = vld [vmem:[#allocation10 + $0x2a8] sm:$0xff]  ;;  %v536_v41 = vpack.c.bf16 %v146_v33, %v142_v32  ;;  %v141_v42 = vld [vmem:[#allocation10 + $0x1d0] sm:$0xff]  ;;  %v150_v45 = vld [vmem:[#allocation10 + $0x218] sm:$0xff]  ;;  %v482_v47 = vpack.c.bf16 %v159_v37, %v155_v35 }
  0x63   :  { %467 = vmatpush1.bf16.msra.mxu0 %v466_v62  ;;  %v145_v43 = vld [vmem:[#allocation10 + $0x1f0] sm:$0xff]  ;;  %v154_v46 = vld [vmem:[#allocation10 + $0x238] sm:$0xff]  ;;  %v484_v48 = vpack.c.bf16 %v168_v39, %v164_v38  ;;  %v163_v49 = vld [vmem:[#allocation10 + $0x280] sm:$0xff] }
  0x64   :  { %469 = vmatprep.subr.bf16.mxu0 %v468_v63  ;;  %v77_v44 = vld [vmem:[#allocation7] sm:$0xff]  ;;  %v167_v50 = vld [vmem:[#allocation10 + $0x2a0] sm:$0xff]  ;;  %v172_v51 = vld [vmem:[#allocation10 + $0x2c8] sm:$0xff]  ;;  %v538_v52 = vpack.c.bf16 %v145_v43, %v141_v42  ;;  %v540_v54 = vpack.c.bf16 %v154_v46, %v150_v45 }
  0x65   :  { %531 = vmatpush1.bf16.msra.mxu1 %v530_v27  ;;  %297 = vmatprep.mubr.f32.mxu0 %v77_v44  ;;  %v176_v53 = vld [vmem:[#allocation10 + $0x2e8] sm:$0xff]  ;;  %v149_v55 = vld [vmem:[#allocation10 + $0x210] sm:$0xff]  ;;  %v158_v57 = vld [vmem:[#allocation10 + $0x258] sm:$0xff]  ;;  %v486_v59 = vpack.c.bf16 %v167_v50, %v163_v49 }
  0x66   :  { %533 = vmatprep.subr.bf16.mxu1 %v532_v29  ;;  %368 = vmatprep.mubr.f32.mxu1 %v77_v44  ;;  %v153_v56 = vld [vmem:[#allocation10 + $0x230] sm:$0xff]  ;;  %v162_v58 = vld [vmem:[#allocation10 + $0x278] sm:$0xff]  ;;  %v488_v60 = vpack.c.bf16 %v176_v53, %v172_v51  ;;  %v171_v61 = vld [vmem:[#allocation10 + $0x2c0] sm:$0xff] }
  0x67   :  { %471 = vmatpush1.bf16.msra.mxu0 %v470_v10  ;;  %v175_v62 = vld [vmem:[#allocation10 + $0x2e0] sm:$0xff]  ;;  %v180_v63 = vld [vmem:[#allocation10 + $0x308] sm:$0xff]  ;;  %v542_v0 = vpack.c.bf16 %v153_v56, %v149_v55  ;;  %v544_v2 = vpack.c.bf16 %v162_v58, %v158_v57  ;;  %v157_v3 = vld [vmem:[#allocation10 + $0x250] sm:$0xff] }
  0x68   :  { %473 = vmatprep.subr.bf16.mxu0 %v472_v11  ;;  %v184_v1 = vld [vmem:[#allocation10 + $0x328] sm:$0xff]  ;;  %v161_v4 = vld [vmem:[#allocation10 + $0x270] sm:$0xff]  ;;  %v166_v5 = vld [vmem:[#allocation10 + $0x298] sm:$0xff]  ;;  %v490_v7 = vpack.c.bf16 %v175_v62, %v171_v61 }
  0x69   :  { %535 = vmatpush1.bf16.msra.mxu1 %v534_v40  ;;  %v170_v6 = vld [vmem:[#allocation10 + $0x2b8] sm:$0xff]  ;;  %v492_v8 = vpack.c.bf16 %v184_v1, %v180_v63  ;;  %v179_v9 = vld [vmem:[#allocation10 + $0x300] sm:$0xff]  ;;  %v188_v11 = vld [vmem:[#allocation10 + $0x348] sm:$0xff]  ;;  %v546_v12 = vpack.c.bf16 %v161_v4, %v157_v3 }
  0x6a   :  { %537 = vmatprep.subr.bf16.mxu1 %v536_v41  ;;  %v183_v10 = vld [vmem:[#allocation10 + $0x320] sm:$0xff]  ;;  %v192_v13 = vld [vmem:[#allocation10 + $0x368] sm:$0xff]  ;;  %v548_v14 = vpack.c.bf16 %v170_v6, %v166_v5  ;;  %v165_v15 = vld [vmem:[#allocation10 + $0x290] sm:$0xff] }
  0x6b   :  { %475 = vmatpush1.bf16.msra.mxu0 %v474_v22  ;;  %v169_v16 = vld [vmem:[#allocation10 + $0x2b0] sm:$0xff]  ;;  %v174_v17 = vld [vmem:[#allocation10 + $0x2d8] sm:$0xff]  ;;  %v494_v19 = vpack.c.bf16 %v183_v10, %v179_v9  ;;  %v496_v20 = vpack.c.bf16 %v192_v13, %v188_v11  ;;  %v187_v21 = vld [vmem:[#allocation10 + $0x340] sm:$0xff] }
  0x6c   :  { %477 = vmatprep.subr.bf16.mxu0 %v476_v23  ;;  %v178_v18 = vld [vmem:[#allocation10 + $0x2f8] sm:$0xff]  ;;  %v191_v22 = vld [vmem:[#allocation10 + $0x360] sm:$0xff]  ;;  %v196_v23 = vld [vmem:[#allocation10 + $0x388] sm:$0xff]  ;;  %v550_v24 = vpack.c.bf16 %v169_v16, %v165_v15 }
  0x6d   :  { %539 = vmatpush1.bf16.msra.mxu1 %v538_v52  ;;  %v200_v25 = vld [vmem:[#allocation10 + $0x3a8] sm:$0xff]  ;;  %v552_v26 = vpack.c.bf16 %v178_v18, %v174_v17  ;;  %v173_v27 = vld [vmem:[#allocation10 + $0x2d0] sm:$0xff]  ;;  %v182_v29 = vld [vmem:[#allocation10 + $0x318] sm:$0xff]  ;;  %v498_v31 = vpack.c.bf16 %v191_v22, %v187_v21 }
  0x6e   :  { %541 = vmatprep.subr.bf16.mxu1 %v540_v54  ;;  %v177_v28 = vld [vmem:[#allocation10 + $0x2f0] sm:$0xff]  ;;  %v186_v30 = vld [vmem:[#allocation10 + $0x338] sm:$0xff]  ;;  %v500_v32 = vpack.c.bf16 %v200_v25, %v196_v23  ;;  %v195_v33 = vld [vmem:[#allocation10 + $0x380] sm:$0xff] }
  0x6f   :  { %479 = vmatpush1.bf16.msra.mxu0 %v478_v34  ;;  %v199_v34 = vld [vmem:[#allocation10 + $0x3a0] sm:$0xff]  ;;  %v204_v35 = vld [vmem:[#allocation10 + $0x3c8] sm:$0xff]  ;;  %v556_v38 = vpack.c.bf16 %v186_v30, %v182_v29  ;;  %v181_v39 = vld [vmem:[#allocation10 + $0x310] sm:$0xff] }
  0x70   :  { %481 = vmatprep.subr.bf16.mxu0 %v480_v36  ;;  %v554_v36 = vpack.c.bf16 %v177_v28, %v173_v27  ;;  %v208_v37 = vld [vmem:[#allocation10 + $0x3e8] sm:$0xff]  ;;  %v185_v40 = vld [vmem:[#allocation10 + $0x330] sm:$0xff]  ;;  %v190_v41 = vld [vmem:[#allocation10 + $0x358] sm:$0xff]  ;;  %v502_v43 = vpack.c.bf16 %v199_v34, %v195_v33 }
  0x71   :  { %543 = vmatpush1.bf16.msra.mxu1 %v542_v0  ;;  %v194_v42 = vld [vmem:[#allocation10 + $0x378] sm:$0xff]  ;;  %v504_v44 = vpack.c.bf16 %v208_v37, %v204_v35  ;;  %v203_v45 = vld [vmem:[#allocation10 + $0x3c0] sm:$0xff]  ;;  %v189_v49 = vld [vmem:[#allocation10 + $0x350] sm:$0xff] }
  0x72   :  { %545 = vmatprep.subr.bf16.mxu1 %v544_v2  ;;  %v207_v46 = vld [vmem:[#allocation10 + $0x3e0] sm:$0xff]  ;;  %v193_v50 = vld [vmem:[#allocation10 + $0x370] sm:$0xff]  ;;  %v198_v51 = vld [vmem:[#allocation10 + $0x398] sm:$0xff]  ;;  %v213_v2 = vlaneseq }
  0x73   :  { %483 = vmatpush1.bf16.msra.mxu0 %v482_v47  ;;  %v558_v47 = vpack.c.bf16 %v185_v40, %v181_v39  ;;  %v202_v52 = vld [vmem:[#allocation10 + $0x3b8] sm:$0xff]  ;;  %v506_v53 = vpack.c.bf16 %v207_v46, %v203_v45  ;;  %v562_v54 = vpack.c.bf16 %v193_v50, %v189_v49  ;;  %v197_v56 = vld [vmem:[#allocation10 + $0x390] sm:$0xff]  ;;  %v211_v5 = vld [vmem:[%s867_s4] sm:$0xf]  ;;  %s744_s4 = smov [#allocation13]  }
  0x74   :  { %485 = vmatprep.subr.bf16.mxu0 %v484_v48  ;;  %v560_v48 = vpack.c.bf16 %v194_v42, %v190_v41  ;;  %v564_v55 = vpack.c.bf16 %v202_v52, %v198_v51  ;;  %v201_v57 = vld [vmem:[#allocation10 + $0x3b0] sm:$0xff]  ;;  %v206_v58 = vld [vmem:[#allocation10 + $0x3d8] sm:$0xff]  ;;  %v214_v3 = vshrl.u32 %v213_v2, 7  ;;  %s426_s20 = sshll.u32 %s744_s4, 4  ;;  %s427_s20 = int_to_ptr.vmem [resolvable:$true] %s426_s20 }
  0x75   :  { %547 = vmatpush1.bf16.msra.mxu1 %v546_v12  ;;  %v566_v61 = vpack.c.bf16 %v201_v57, %v197_v56  ;;  %v205_v63 = vld [vmem:[#allocation10 + $0x3d0] sm:$0xff]  ;;  %v79_v37 = vld [vmem:[#allocation9] sm:$0xff]  ;;  %s684_s21 = scalar_lea.vmem %s427_s20, 128  ;;  %p689_p5 = scmp.lt.s32.totalorder %s427_s20, %s427_s20 }
  0x76   :  { %549 = vmatprep.subr.bf16.mxu1 %v548_v14  ;;  %v209_v0 = vld [vmem:[#allocation10 + $0x3f0] sm:$0xff]  ;;  %v215_v4 = vsub.s32 0, %v214_v3  ;;  %v219_v6 = vsub.s32 1, %v214_v3  ;;  %v227_v16 = vsub.s32 3, %v214_v3  ;;  %p685_p4 = scmp.ne.s32.totalorder %s427_s20, %s684_s21  ;;  %p690_p6 = scmp.lt.s32.totalorder %s684_s21, %s684_s21 }
  0x77   :  { %487 = vmatpush1.bf16.msra.mxu0 %v486_v59  ;;  %v210_v59 = vld [vmem:[#allocation10 + $0x3f8] sm:$0xff]  ;;  %v570_v1 = vpack.c.bf16 %v209_v0, %v205_v63 }
  0x78   :  { %489 = vmatprep.subr.bf16.mxu0 %v488_v60  ;;  %v81_v60 = vld [vmem:[#allocation4] sm:$0xff]  ;;  %v568_v62 = vpack.c.bf16 %v210_v59, %v206_v58  ;;  %v228_v18 = vrot.slane %v211_v5, %v227_v16  ;;  %p691_p7 = por %p690_p6, %p689_p5 }
  0x79   :  { %551 = vmatpush1.bf16.msra.mxu1 %v550_v24 }
  0x7a   :  { %553 = vmatprep.subr.bf16.mxu1 %v552_v26  ;;  %p692_p8 = pnand %p691_p7, %p685_p4 }
  0x7b   :  { %491 = vmatpush1.bf16.msra.mxu0 %v490_v7  ;;  %v216_v7 = vrot.slane %v211_v5, %v215_v4 }
  0x7c   :  { %493 = vmatprep.subr.bf16.mxu0 %v492_v8  ;;  %v220_v8 = vrot.slane %v211_v5, %v219_v6 }
  0x7d   :  { %555 = vmatpush1.bf16.msra.mxu1 %v554_v36 }
  0x7e   :  { %557 = vmatprep.subr.bf16.mxu1 %v556_v38 }
  0x7f   :  { %495 = vmatpush1.bf16.msra.mxu0 %v494_v19 }
  0x80   :  { %497 = vmatprep.subr.bf16.mxu0 %v496_v20  ;;  %v223_v20 = vsub.s32 2, %v214_v3 }
  0x81   :  { %559 = vmatpush1.bf16.msra.mxu1 %v558_v47 }
  0x82   :  { %561 = vmatprep.subr.bf16.mxu1 %v560_v48  ;;  %v224_v25 = vrot.slane %v211_v5, %v223_v20 }
  0x83   :  { %499 = vmatpush1.bf16.msra.mxu0 %v498_v31 }
  0x84   :  { %501 = vmatprep.subr.bf16.mxu0 %v500_v32 }
  0x85   :  { %563 = vmatpush1.bf16.msra.mxu1 %v562_v54 }
  0x86   :  { %565 = vmatprep.subr.bf16.mxu1 %v564_v55 }
  0x87   :  { %503 = vmatpush1.bf16.msra.mxu0 %v502_v43 }
  0x88   :  { %505 = vmatprep.subr.bf16.mxu0 %v504_v44 }
  0x89   :  { %567 = vmatpush1.bf16.msra.mxu1 %v566_v61 }
  0x8a   :  { %569 = vmatprep.subr.bf16.mxu1 %v568_v62 }
  0x8b   :  { %507 = vmatpush1.bf16.msra.mxu0 %v506_v53 }
  0x8d   :  { %571 = vmatpush1.bf16.msra.mxu1 %v570_v1 }
  0x8e   :  { %298 = vmatmul.mubr.f32.vlgmr.msra.gmra.mrb[0].mxu0 %v81_v60 }
  0x90   :  { %369 = vmatmul.mubr.f32.vlgmr.msra.gmra.mrb[0].mxu1 %v81_v60 }
 0x161   :  { %v299_v9 = vpop.f32.mrb[0].mxu0 }
 0x162   :  { %v300_v10 = vadd.f32 %v299_v9, %v216_v7  ;;  %v301_v11 = vpop.f32.mrb[1].mxu0 }
 0x163   :  { %v302_v12 = vadd.f32 %v301_v11, %v220_v8  ;;  %v370_v15 = vpop.f32.mrb[0].mxu1 }
 0x164   :  { %v441_v13 = vmul.f32 -1.442695, %v300_v10  ;;  %v372_v17 = vpop.f32.mrb[1].mxu1  ;;  %v371_v27 = vadd.f32 %v370_v15, %v224_v25 }
 0x165   :  { %v442_v14 = vmul.f32 -1.442695, %v302_v12  ;;  %v373_v24 = vadd.f32 %v372_v17, %v228_v18 }
 0x166   :  { %580 = vpow2.f32 %v441_v13 }
 0x167   :  { %582 = vpow2.f32 %v442_v14  ;;  %v443_v26 = vmul.f32 -1.442695, %v373_v24 }
 0x170   :  { %v581_v19 = vpop.eup %580 }
 0x171   :  { %v583_v21 = vpop.eup %582  ;;  %v378_v22 = vadd.f32 1.0, %v581_v19 }
 0x172   :  { %v384_v23 = vadd.f32 1.0, %v583_v21 }
 0x173   :  { %584 = vrcp.f32 %v378_v22 }
 0x174   :  { %586 = vrcp.f32 %v384_v23 }
 0x175   :  { %588 = vpow2.f32 %v443_v26 }
 0x176   :  { %590 = vtanh.f32 %v371_v27 }
 0x17d   :  { %v585_v28 = vpop.eup %584 }
 0x17e   :  { %v587_v29 = vpop.eup %586  ;;  %v395_v30 = vsub.f32 1.0, %v585_v28 }
 0x17f   :  { %v394_v31 = vmul.f32 2.0, %v587_v29  ;;  %v589_v34 = vpop.eup %588 }
 0x180   :  { %v591_v36 = vpop.eup %590  ;;  %v391_v39 = vadd.f32 1.0, %v589_v34 }
 0x181   :  { %v396_v32 = vmul.f32 %v395_v30, %v394_v31 }
 0x182   :  { %592 = vrcp.f32 %v391_v39 }
 0x183   :  { %v397_v33 = vadd.f32 %v585_v28, %v396_v32 }
 0x185   :  { %v398_v35 = vmul.f32 %v585_v28, %v397_v33 }
 0x187   :  { %v401_v38 = vsub.f32 1.0, %v398_v35  ;;  %v400_v40 = vmul.f32 %v398_v35, %v79_v37 }
 0x189   :  { %v402_v41 = vmul.f32 %v591_v36, %v401_v38 }
 0x18b   :  { %v403_v42 = vadd.f32 %v402_v41, %v400_v40 }
 0x18d   :  { %409 = vst [vmem:[#allocation13] sm:$0xff] %v403_v42  ;;  %594 = vtanh.f32 %v403_v42 }
 0x18e   :  { %695 = shalt.err (!%p692_p8)
}
 0x18f   :  { %s696_s25 = scalar_lea.hbm %s869_s6, 128 }
 0x190   :  { %p697_p9 = scmp.ne.s32.totalorder %s869_s6, %s696_s25  ;;  %p700_p10 = scmp.lt.u32.totalorder %s696_s25, %s869_s6 }
 0x192   :  { %p702_p11 = pnand %p700_p10, %p697_p9 }
 0x194   :  { %705 = shalt.err (!%p702_p11)
}
 0x195   :  { %429 = dma.vmem_to_hbm [thread:$0]  %s427_s20, 128, %s869_s6, [#allocation14]   ;;  %v593_v43 = vpop.eup %592 }
 0x196   :  { %s745_s0 = smov [#allocation12]  }
 0x197   :  { %s416_s24 = sshll.u32 %s745_s0, 4  ;;  %v595_v44 = vpop.eup %594  ;;  %s417_s24 = int_to_ptr.vmem [resolvable:$true] %s416_s24 }
 0x198   :  { %v405_v45 = vmul.f32 %v595_v44, %v593_v43  ;;  %s706_s8 = scalar_lea.vmem %s417_s24, 128  ;;  %p711_p13 = scmp.lt.s32.totalorder %s417_s24, %s417_s24 }
 0x199   :  { %p707_p12 = scmp.ne.s32.totalorder %s417_s24, %s706_s8  ;;  %p712_p0 = scmp.lt.s32.totalorder %s706_s8, %s706_s8 }
 0x19a   :  { %408 = vst [vmem:[#allocation12] sm:$0xff] %v405_v45 }
 0x19b   :  { %p713_p1 = por %p712_p0, %p711_p13 }
 0x19d   :  { %p714_p2 = pnand %p713_p1, %p707_p12 }
 0x19f   :  { %717 = shalt.err (!%p714_p2)
}
 0x1a0   :  { %s718_s11 = scalar_lea.hbm %s868_s5, 128 }
 0x1a1   :  { %p719_p3 = scmp.ne.s32.totalorder %s868_s5, %s718_s11  ;;  %p722_p4 = scmp.lt.u32.totalorder %s718_s11, %s868_s5 }
 0x1a3   :  { %p724_p5 = pnand %p722_p4, %p719_p3 }
 0x1a5   :  { %727 = shalt.err (!%p724_p5)
}
 0x1a6   :  { %419 = dma.vmem_to_hbm [thread:$0]  %s417_s24, 128, %s868_s5, [#allocation6]  }
 0x1a7   :  { %734 = dma.done.wait [#allocation6], 128  }
 0x1a8   :  { %735 = vsyncadd [#allocation6], 4294967168 }
 0x1a9   :  { %736 = dma.done.wait [#allocation14], 128  }
 0x1aa   :  { %737 = vsyncadd [#allocation14], 4294967168 }
 0x1ab   :  { %436 = vsyncpa [#allocation5], 1 }
 0x1ac   :  { %437 = vsyncpa [#allocation8], 1 }
 0x1ad   :  { %438 = vsyncpa [#allocation11], 1 }
 0x1ae   :  { %439 = vsyncpa [#allocation6], 1 }
 0x1af   :  { %440 = vsyncpa [#allocation14], 1 }

</bundles_post_ra>
